<compile_context>
chip_gen: v7x
topology: tpu7x:2x2x1
jax: 0.10.0
libtpu: 0.0.40
codegen_flags: <defaults>
</compile_context>

<pallas_src>
import functools

import jax
import jax.numpy as jnp
from jax import lax
from jax.experimental import pallas as pl
from jax.experimental.pallas import tpu as pltpu


VMEM_LIMIT = 48 * 1024 * 1024  # below v7x's 64 MiB physical, above 32 MiB default


def _pick_tile(dim, targets):
    """Largest target tile that evenly divides dim; fall back to full extent."""
    for t in targets:
        if t <= dim and dim % t == 0:
            return t
    return dim


# ----------------------------- Pallas kernels -----------------------------

def _norm_matmul_kernel(x_ref, gm_ref, w_ref, o_ref, *, eps):
    # RMSNorm fused into the consumer projection (first layer, no residual add).
    x = x_ref[...].astype(jnp.float32)
    var = jnp.mean(x * x, axis=-1, keepdims=True)
    xn = (x * lax.rsqrt(var + eps)) * gm_ref[...].astype(jnp.float32)
    o_ref[...] = jnp.dot(
        xn.astype(w_ref.dtype), w_ref[...], preferred_element_type=jnp.float32
    ).astype(o_ref.dtype)


def _addnorm_matmul_kernel(x_ref, r_ref, gm_ref, w_ref, o_ref, res_ref, *, eps):
    # vLLM fused residual-add RMSNorm + consumer projection:
    #   t = x + residual; residual_out = t; o = rmsnorm(t) @ W
    t = x_ref[...].astype(jnp.float32) + r_ref[...].astype(jnp.float32)
    res_ref[...] = t.astype(res_ref.dtype)
    var = jnp.mean(t * t, axis=-1, keepdims=True)
    xn = (t * lax.rsqrt(var + eps)) * gm_ref[...].astype(jnp.float32)
    o_ref[...] = jnp.dot(
        xn.astype(w_ref.dtype), w_ref[...], preferred_element_type=jnp.float32
    ).astype(o_ref.dtype)


def _matmul_kernel(x_ref, w_ref, o_ref, acc_ref):
    # Tiled matmul with K-reduction accumulator (o_proj).
    @pl.when(pl.program_id(2) == 0)
    def _():
        acc_ref[...] = jnp.zeros_like(acc_ref)

    acc_ref[...] += jnp.dot(
        x_ref[...], w_ref[...], preferred_element_type=jnp.float32)

    @pl.when(pl.program_id(2) == pl.num_programs(2) - 1)
    def _():
        o_ref[...] = acc_ref[...].astype(o_ref.dtype)


def _addnorm_mlp_kernel(x_ref, r_ref, gm_ref, wg_ref, wu_ref, wd_ref,
                        o_ref, res_ref, acc_ref, *, eps):
    # fused residual-add RMSNorm + gate_up proj + SiLU*mul + down proj,
    # tiled over the intermediate dimension (grid axis 1, "arbitrary").
    j = pl.program_id(1)
    t = x_ref[...].astype(jnp.float32) + r_ref[...].astype(jnp.float32)

    @pl.when(j == 0)
    def _():
        res_ref[...] = t.astype(res_ref.dtype)
        acc_ref[...] = jnp.zeros_like(acc_ref)

    var = jnp.mean(t * t, axis=-1, keepdims=True)
    xn = ((t * lax.rsqrt(var + eps)) * gm_ref[...].astype(jnp.float32)
          ).astype(wg_ref.dtype)
    gate = jnp.dot(xn, wg_ref[...], preferred_element_type=jnp.float32)
    up = jnp.dot(xn, wu_ref[...], preferred_element_type=jnp.float32)
    act = (gate * jax.nn.sigmoid(gate)) * up
    acc_ref[...] += jnp.dot(
        act.astype(wd_ref.dtype), wd_ref[...], preferred_element_type=jnp.float32)

    @pl.when(j == pl.num_programs(1) - 1)
    def _():
        o_ref[...] = acc_ref[...].astype(o_ref.dtype)


def _final_norm_kernel(x_ref, r_ref, gm_ref, o_ref, *, eps):
    t = x_ref[...].astype(jnp.float32) + r_ref[...].astype(jnp.float32)
    var = jnp.mean(t * t, axis=-1, keepdims=True)
    o_ref[...] = ((t * lax.rsqrt(var + eps)) *
                  gm_ref[...].astype(jnp.float32)).astype(o_ref.dtype)


def _flash_attn_kernel(q_ref, k_ref, v_ref, o_ref, m_ref, l_ref, acc_ref,
                       *, scale, rep, tq, tk):
    # One (batch, kv_head) group per grid point; q_ref holds the `rep` query heads
    # that share this KV head (GQA without materializing repeated K/V).
    qi = pl.program_id(2)
    ki = pl.program_id(3)

    @pl.when(ki == 0)
    def _():
        m_ref[...] = jnp.full(m_ref.shape, -jnp.inf, dtype=jnp.float32)
        l_ref[...] = jnp.zeros_like(l_ref)
        acc_ref[...] = jnp.zeros_like(acc_ref)

    # Skip KV blocks that are fully above the causal diagonal.
    @pl.when(ki * tk <= qi * tq + (tq - 1))
    def _():
        k = k_ref[...]                                   # (tk, D), input dtype
        v = v_ref[...]                                   # (tk, D)
        q_pos = qi * tq + lax.broadcasted_iota(jnp.int32, (tq, tk), 0)
        k_pos = ki * tk + lax.broadcasted_iota(jnp.int32, (tq, tk), 1)
        mask = q_pos >= k_pos
        for r in range(rep):                             # static unroll over q heads
            qh = q_ref[r]                                # (tq, D)
            s = lax.dot_general(
                qh, k, (((1,), (1,)), ((), ())),
                preferred_element_type=jnp.float32) * scale
            s = jnp.where(mask, s, -1e30)
            m_prev = m_ref[r]                            # (tq, 1)
            m_new = jnp.maximum(m_prev, jnp.max(s, axis=-1, keepdims=True))
            alpha = jnp.exp(m_prev - m_new)
            p = jnp.exp(s - m_new)
            l_ref[r] = alpha * l_ref[r] + jnp.sum(p, axis=-1, keepdims=True)
            acc_ref[r] = alpha * acc_ref[r] + jnp.dot(
                p.astype(v.dtype), v, preferred_element_type=jnp.float32)
            m_ref[r] = m_new

    @pl.when(ki == pl.num_programs(3) - 1)
    def _():
        for r in range(rep):
            inv = pl.reciprocal(l_ref[r], approx=True)
            o_ref[r] = (acc_ref[r] * inv).astype(o_ref.dtype)


# ----------------------------- kernel wrappers -----------------------------

def norm_matmul(x, gamma, w, eps):
    M, K = x.shape
    _, N = w.shape
    tm = _pick_tile(M, (256, 128, 64, 32, 16, 8))
    tn = _pick_tile(N, (256, 128))
    return pl.pallas_call(
        functools.partial(_norm_matmul_kernel, eps=eps),
        grid=(M // tm, N // tn),
        in_specs=[pl.BlockSpec((tm, K), lambda i, j: (i, 0)),
                  pl.BlockSpec((1, K), lambda i, j: (0, 0)),
                  pl.BlockSpec((K, tn), lambda i, j: (0, j))],
        out_specs=pl.BlockSpec((tm, tn), lambda i, j: (i, j)),
        out_shape=jax.ShapeDtypeStruct((M, N), x.dtype),
        compiler_params=pltpu.CompilerParams(
            dimension_semantics=("parallel", "parallel"),
            vmem_limit_bytes=VMEM_LIMIT),
    )(x, gamma, w)


def addnorm_matmul(x, residual, gamma, w, eps):
    M, K = x.shape
    _, N = w.shape
    tm = _pick_tile(M, (256, 128, 64, 32, 16, 8))
    tn = _pick_tile(N, (256, 128))
    return pl.pallas_call(
        functools.partial(_addnorm_matmul_kernel, eps=eps),
        grid=(M // tm, N // tn),
        in_specs=[pl.BlockSpec((tm, K), lambda i, j: (i, 0)),
                  pl.BlockSpec((tm, K), lambda i, j: (i, 0)),
                  pl.BlockSpec((1, K), lambda i, j: (0, 0)),
                  pl.BlockSpec((K, tn), lambda i, j: (0, j))],
        out_specs=[pl.BlockSpec((tm, tn), lambda i, j: (i, j)),
                   pl.BlockSpec((tm, K), lambda i, j: (i, 0))],
        out_shape=(jax.ShapeDtypeStruct((M, N), x.dtype),
                   jax.ShapeDtypeStruct((M, K), x.dtype)),
        compiler_params=pltpu.CompilerParams(
            dimension_semantics=("parallel", "arbitrary"),
            vmem_limit_bytes=VMEM_LIMIT),
    )(x, residual, gamma, w)


def linear(x, w):
    M, K = x.shape
    _, N = w.shape
    tm = _pick_tile(M, (256, 128, 64, 32, 16, 8))
    tn = _pick_tile(N, (256, 128))
    tk = _pick_tile(K, (512, 256, 128))
    return pl.pallas_call(
        _matmul_kernel,
        grid=(M // tm, N // tn, K // tk),
        in_specs=[pl.BlockSpec((tm, tk), lambda i, j, k: (i, k)),
                  pl.BlockSpec((tk, tn), lambda i, j, k: (k, j))],
        out_specs=pl.BlockSpec((tm, tn), lambda i, j, k: (i, j)),
        out_shape=jax.ShapeDtypeStruct((M, N), x.dtype),
        scratch_shapes=[pltpu.VMEM((tm, tn), jnp.float32)],
        compiler_params=pltpu.CompilerParams(
            dimension_semantics=("parallel", "parallel", "arbitrary"),
            vmem_limit_bytes=VMEM_LIMIT),
    )(x, w)


def addnorm_mlp(x, residual, gamma, gate_up_w, down_w, inter, eps):
    M, H = x.shape
    tm = _pick_tile(M, (256, 128, 64, 32, 16, 8))
    ti = _pick_tile(inter, (256, 128))
    n_i = inter // ti
    return pl.pallas_call(
        functools.partial(_addnorm_mlp_kernel, eps=eps),
        grid=(M // tm, n_i),
        in_specs=[pl.BlockSpec((tm, H), lambda i, j: (i, 0)),        # x
                  pl.BlockSpec((tm, H), lambda i, j: (i, 0)),        # residual
                  pl.BlockSpec((1, H), lambda i, j: (0, 0)),         # gamma
                  pl.BlockSpec((H, ti), lambda i, j: (0, j)),        # gate cols
                  pl.BlockSpec((H, ti), lambda i, j: (0, j + n_i)),  # up cols
                  pl.BlockSpec((ti, H), lambda i, j: (j, 0))],       # down rows
        out_specs=[pl.BlockSpec((tm, H), lambda i, j: (i, 0)),       # mlp out
                   pl.BlockSpec((tm, H), lambda i, j: (i, 0))],      # residual out
        out_shape=(jax.ShapeDtypeStruct((M, H), x.dtype),
                   jax.ShapeDtypeStruct((M, H), x.dtype)),
        scratch_shapes=[pltpu.VMEM((tm, H), jnp.float32)],
        compiler_params=pltpu.CompilerParams(
            dimension_semantics=("parallel", "arbitrary"),
            vmem_limit_bytes=VMEM_LIMIT),
    )(x, residual, gamma, gate_up_w, gate_up_w, down_w)


def final_norm(x, residual, gamma, eps):
    M, H = x.shape
    tm = _pick_tile(M, (512, 256, 128, 64, 32, 16, 8))
    return pl.pallas_call(
        functools.partial(_final_norm_kernel, eps=eps),
        grid=(M // tm,),
        in_specs=[pl.BlockSpec((tm, H), lambda i: (i, 0)),
                  pl.BlockSpec((tm, H), lambda i: (i, 0)),
                  pl.BlockSpec((1, H), lambda i: (0, 0))],
        out_specs=pl.BlockSpec((tm, H), lambda i: (i, 0)),
        out_shape=jax.ShapeDtypeStruct((M, H), x.dtype),
        compiler_params=pltpu.CompilerParams(
            dimension_semantics=("parallel",),
            vmem_limit_bytes=VMEM_LIMIT),
    )(x, residual, gamma)


def flash_attention(q, k, v, scale):
    # q: (B, G, rep, S, D)   k, v: (B, G, S, D)   with G = num_kv_heads
    B, G, R, S, D = q.shape
    tq = _pick_tile(S, (128,))
    tk = _pick_tile(S, (128,))
    q_spec = pl.BlockSpec((None, None, R, tq, D),
                          lambda b, g, qi, ki: (b, g, 0, qi, 0))
    kv_spec = pl.BlockSpec((None, None, tk, D),
                           lambda b, g, qi, ki: (b, g, ki, 0))
    return pl.pallas_call(
        functools.partial(_flash_attn_kernel, scale=scale, rep=R, tq=tq, tk=tk),
        grid=(B, G, S // tq, S // tk),
        in_specs=[q_spec, kv_spec, kv_spec],
        out_specs=q_spec,
        out_shape=jax.ShapeDtypeStruct((B, G, R, S, D), q.dtype),
        scratch_shapes=[pltpu.VMEM((R, tq, 1), jnp.float32),
                        pltpu.VMEM((R, tq, 1), jnp.float32),
                        pltpu.VMEM((R, tq, D), jnp.float32)],
        compiler_params=pltpu.CompilerParams(
            dimension_semantics=("parallel", "parallel", "parallel", "arbitrary"),
            vmem_limit_bytes=VMEM_LIMIT),
    )(q, k, v)


# ------------------------------- JAX glue ---------------------------------

def rope_cos_sin(positions, head_dim, theta):
    # Neox-style rotary tables, computed ONCE per forward (hoisted out of layers).
    half = head_dim // 2
    inv_freq = 1.0 / (theta ** (jnp.arange(0, half, dtype=jnp.float32) * 2.0 / head_dim))
    freqs = positions.astype(jnp.float32)[..., None] * inv_freq     # (B, S, half)
    return jnp.cos(freqs)[:, :, None, :], jnp.sin(freqs)[:, :, None, :]


def apply_rope(x, cos, sin):
    # TODO(synk): could be fused into the QKV / attention kernels with pltpu.roll.
    half = x.shape[-1] // 2
    x1 = x[..., :half]
    x2 = x[..., half:]
    out = jnp.concatenate([x1 * cos - x2 * sin, x2 * cos + x1 * sin], axis=-1)
    return out.astype(x.dtype)


def init_params(key, cfg):
    H = cfg['hidden_size']
    nh, nkv, hd = cfg['num_heads'], cfg['num_kv_heads'], cfg['head_dim']
    inter = cfg['intermediate_size']
    V = cfg['vocab_size']

    def normal(k, shape, scale=0.02):
        return scale * jax.random.normal(k, shape, dtype=jnp.float32)

    keys = jax.random.split(key, 2 + cfg['num_layers'])
    params = {
        'embed_tokens': normal(keys[0], (V, H)),
        'norm': jnp.ones((1, H), jnp.float32),
        'lm_head': normal(keys[1], (V, H)),  # TODO(synk): lm_head/Sampler are not part of forward(); unused here.
        'layers': [],
    }
    for i in range(cfg['num_layers']):
        k0, k1, k2, k3 = jax.random.split(keys[2 + i], 4)
        params['layers'].append({
            'input_layernorm': jnp.ones((1, H), jnp.float32),
            'post_attention_layernorm': jnp.ones((1, H), jnp.float32),
            'qkv_w': normal(k0, (H, (nh + 2 * nkv) * hd)),
            'o_w': normal(k1, (nh * hd, H)),
            'gate_up_w': normal(k2, (H, 2 * inter)),
            'down_w': normal(k3, (inter, H)),
        })
    return params


def llama_forward(params, input_ids, positions, cfg):
    """Equivalent of LlamaForCausalLM.forward -> hidden_states (B, S, H)."""
    # TODO(synk): paged KV-cache writeback and cache-fuse (status 1/2) token pruning
    #             have no clean equivalent here; this is the plain prompt path (status=0).
    B, S = input_ids.shape
    H = cfg['hidden_size']
    nh, nkv, hd = cfg['num_heads'], cfg['num_kv_heads'], cfg['head_dim']
    rep = nh // nkv
    q_size, kv_size = nh * hd, nkv * hd
    scale = float(hd) ** -0.5
    eps = cfg['rms_norm_eps']

    cos, sin = rope_cos_sin(positions, hd, cfg['rope_theta'])

    hidden = jnp.take(params['embed_tokens'], input_ids, axis=0)    # (B, S, H)
    hs2d = hidden.reshape(B * S, H)
    residual = None

    for layer in params['layers']:
        # --- input layernorm (+ residual add) fused into QKV projection ---
        if residual is None:
            residual = hs2d
            qkv = norm_matmul(hs2d, layer['input_layernorm'], layer['qkv_w'], eps)
        else:
            qkv, residual = addnorm_matmul(
                hs2d, residual, layer['input_layernorm'], layer['qkv_w'], eps)

        # --- self attention (GQA flash) ---
        q = qkv[:, :q_size].reshape(B, S, nh, hd)
        k = qkv[:, q_size:q_size + kv_size].reshape(B, S, nkv, hd)
        v = qkv[:, q_size + kv_size:].reshape(B, S, nkv, hd)
        q = apply_rope(q, cos, sin)
        k = apply_rope(k, cos, sin)
        # group query heads by their KV head: (B, nkv, rep, S, hd) / (B, nkv, S, hd)
        qg = q.transpose(0, 2, 1, 3).reshape(B, nkv, rep, S, hd)
        kg = k.transpose(0, 2, 1, 3)
        vg = v.transpose(0, 2, 1, 3)
        attn = flash_attention(qg, kg, vg, scale)                   # (B, nkv, rep, S, hd)
        attn = attn.reshape(B, nh, S, hd).transpose(0, 2, 1, 3).reshape(B * S, nh * hd)
        hs2d = linear(attn, layer['o_w'])

        # --- post-attention layernorm + MLP, fused ---
        hs2d, residual = addnorm_mlp(
            hs2d, residual, layer['post_attention_layernorm'],
            layer['gate_up_w'], layer['down_w'], cfg['intermediate_size'], eps)

    final = final_norm(hs2d, residual, params['norm'], eps)
    return final.reshape(B, S, H)


# ---------------------------------- main -----------------------------------

if __name__ == "__main__":
    cfg = dict(
        vocab_size=128,
        hidden_size=32,
        num_heads=4,
        num_kv_heads=2,
        head_dim=8,            # hidden_size // num_heads
        intermediate_size=64,
        num_layers=2,
        rms_norm_eps=1e-6,
        rope_theta=10000.0,
    )
    B, S = 2, 8

    key = jax.random.PRNGKey(0)
    pkey, ikey = jax.random.split(key)
    params = init_params(pkey, cfg)

    input_ids = jax.random.randint(ikey, (B, S), 0, cfg['vocab_size'], dtype=jnp.int32)
    positions = jnp.broadcast_to(jnp.arange(S, dtype=jnp.int32)[None, :], (B, S))

    hidden_states = llama_forward(params, input_ids, positions, cfg)
    hidden_states = jax.block_until_ready(hidden_states)
    assert hidden_states.shape == (B, S, cfg['hidden_size'])
    assert bool(jnp.all(jnp.isfinite(hidden_states)))
    print("KERNEL_OK")
</pallas_src>

<mosaic_0001>
module attributes {stable_mosaic.version = 11 : i64} {
  func.func @_norm_matmul_kernel(%arg0: i32, %arg1: i32, %arg2: memref<16x32xf32, #tpu.memory_space<vmem>>, %arg3: memref<1x32xf32, #tpu.memory_space<vmem>>, %arg4: memref<32x64xf32, #tpu.memory_space<vmem>>, %arg5: memref<16x64xf32, #tpu.memory_space<vmem>>) attributes {dimension_semantics = [#tpu.dimension_semantics<parallel>, #tpu.dimension_semantics<parallel>], iteration_bounds = array<i64: 1, 1>, scalar_prefetch = 0 : i64, scratch_operands = 0 : i64, tpu.core_type = #tpu.core_type<tc>, window_params = [{transform_indices = @transform_0, window_bounds = array<i64: 16, 32>}, {pipeline_mode = #tpu.pipeline_mode<synchronous>, transform_indices = @transform_1, window_bounds = array<i64: 1, 32>}, {transform_indices = @transform_2, window_bounds = array<i64: 32, 64>}, {transform_indices = @transform_3, window_bounds = array<i64: 16, 64>}]} {
    %c0 = arith.constant 0 : index
    %c0_0 = arith.constant 0 : index
    %0 = vector.load %arg2[%c0, %c0_0] : memref<16x32xf32, #tpu.memory_space<vmem>>, vector<16x32xf32>
    %1 = arith.mulf %0, %0 : vector<16x32xf32>
    %cst = arith.constant dense<0.000000e+00> : vector<16xf32>
    %2 = vector.multi_reduction <add>, %1, %cst [1] : vector<16x32xf32> to vector<16xf32>
    %3 = vector.shape_cast %2 : vector<16xf32> to vector<16x1xf32>
    %cst_1 = arith.constant 3.200000e+01 : f32
    %4 = vector.broadcast %cst_1 : f32 to vector<16x1xf32>
    %5 = arith.divf %3, %4 : vector<16x1xf32>
    %cst_2 = arith.constant 9.99999997E-7 : f32
    %6 = vector.broadcast %cst_2 : f32 to vector<16x1xf32>
    %7 = arith.addf %5, %6 : vector<16x1xf32>
    %8 = math.rsqrt %7 : vector<16x1xf32>
    %9 = vector.broadcast %8 : vector<16x1xf32> to vector<16x32xf32>
    %10 = arith.mulf %0, %9 : vector<16x32xf32>
    %c0_3 = arith.constant 0 : index
    %c0_4 = arith.constant 0 : index
    %11 = vector.load %arg3[%c0_3, %c0_4] : memref<1x32xf32, #tpu.memory_space<vmem>>, vector<1x32xf32>
    %12 = vector.broadcast %11 : vector<1x32xf32> to vector<16x32xf32>
    %13 = arith.mulf %10, %12 : vector<16x32xf32>
    %c0_5 = arith.constant 0 : index
    %c0_6 = arith.constant 0 : index
    %14 = vector.load %arg4[%c0_5, %c0_6] : memref<32x64xf32, #tpu.memory_space<vmem>>, vector<32x64xf32>
    %cst_7 = arith.constant dense<0.000000e+00> : vector<16x64xf32>
    %15 = tpu.matmul %13, %14, %cst_7 {dimension_numbers = #tpu.dot_dimension_numbers<[1], [0], [0], [1], [0, 0, 1, 1], [], []>} : vector<16x32xf32>, vector<32x64xf32>, vector<16x64xf32> -> vector<16x64xf32>
    %c0_8 = arith.constant 0 : index
    %c0_9 = arith.constant 0 : index
    %16 = vector.load %arg5[%c0_8, %c0_9] : memref<16x64xf32, #tpu.memory_space<vmem>>, vector<16x64xf32>
    tpu.vector_store %arg5[%c0_8, %c0_9], %15 {strides = array<i32>} : memref<16x64xf32, #tpu.memory_space<vmem>>, vector<16x64xf32>,
    return
  }
  func.func @transform_0(%arg0: i32, %arg1: i32) -> (i32, i32) {
    %c0_i32 = arith.constant 0 : i32
    %c0_i32_0 = arith.constant 0 : i32
    return %arg0, %c0_i32 : i32, i32
  }
  func.func @transform_1(%arg0: i32, %arg1: i32) -> (i32, i32) {
    %c0_i32 = arith.constant 0 : i32
    %c0_i32_0 = arith.constant 0 : i32
    %c0_i32_1 = arith.constant 0 : i32
    return %c0_i32, %c0_i32_0 : i32, i32
  }
  func.func @transform_2(%arg0: i32, %arg1: i32) -> (i32, i32) {
    %c0_i32 = arith.constant 0 : i32
    %c0_i32_0 = arith.constant 0 : i32
    return %c0_i32, %arg1 : i32, i32
  }
  func.func @transform_3(%arg0: i32, %arg1: i32) -> (i32, i32) {
    %c0_i32 = arith.constant 0 : i32
    return %arg0, %arg1 : i32, i32
  }
}

</mosaic_0001>

<bundles_post_ra>
// kernel: tpu_custom_call.1
= control target key start
LH: loop header
LB: loop body
LE: loop exit
PB: predicated region body
PF: predicated region fallthrough
CT: control target
= control target key end

     0   :  { %8 = vsyncpa [#allocation3], 0  ;;  %s364_s0 = inlined_call_operand.hbm [shape: f32[16,32], index: 0, kind: input, shape index: {}]   ;;  %s365_s1 = inlined_call_operand.vmem [shape: f32[1,32], index: 1, kind: input, shape index: {}]   ;;  %s366_s2 = inlined_call_operand.hbm [shape: f32[32,64], index: 2, kind: input, shape index: {}]   ;;  %s367_s3 = inlined_call_operand.hbm [shape: f32[16,64], index: 3, kind: output, shape index: {}]  }
   0x1   :  { %9 = vsyncpa [#allocation6], 0 }
   0x2   :  { %10 = vsyncpa [#allocation4], 0  ;;  %s287_s12 = smov [#allocation2]   ;;  %s215_s16 = scalar_lea.hbm %s364_s0, 256 }
   0x3   :  { %s16_s13 = sshll.u32 %s287_s12, 4  ;;  %p216_p0 = scmp.ne.s32.totalorder %s364_s0, %s215_s16  ;;  %s17_s13 = int_to_ptr.vmem [resolvable:$true] %s16_s13 }
   0x4   :  { %p219_p1 = scmp.lt.u32.totalorder %s215_s16, %s364_s0 }
   0x6   :  { %p221_p2 = pnand %p219_p1, %p216_p0 }
   0x8   :  { %224 = shalt.err (!%p221_p2)
}
   0x9   :  { %s225_s21 = scalar_lea.vmem %s17_s13, 256  ;;  %p230_p4 = scmp.lt.s32.totalorder %s17_s13, %s17_s13 }
   0xa   :  { %p226_p3 = scmp.ne.s32.totalorder %s17_s13, %s225_s21  ;;  %p231_p5 = scmp.lt.s32.totalorder %s225_s21, %s225_s21 }
   0xc   :  { %p232_p6 = por %p231_p5, %p230_p4 }
   0xe   :  { %p233_p7 = pnand %p232_p6, %p226_p3 }
  0x10   :  { %236 = shalt.err (!%p233_p7)
}
  0x11   :  { %s288_s22 = smov 128   ;;  %s289_s23 = smov 8  }
  0x12   :  { %22 = dma.hbm_to_vmem [thread:$0]  %s364_s0, 256, %s17_s13, [#allocation3], %s288_s22, %s288_s22, %s289_s23  }
  0x13   :  { %s290_s26 = smov [#allocation5]   ;;  %s237_s30 = scalar_lea.hbm %s366_s2, 512 }
  0x14   :  { %s30_s27 = sshll.u32 %s290_s26, 4  ;;  %p238_p8 = scmp.ne.s32.totalorder %s366_s2, %s237_s30  ;;  %s31_s27 = int_to_ptr.vmem [resolvable:$true] %s30_s27 }
  0x15   :  { %p241_p9 = scmp.lt.u32.totalorder %s237_s30, %s366_s2 }
  0x17   :  { %p243_p10 = pnand %p241_p9, %p238_p8 }
  0x19   :  { %246 = shalt.err (!%p243_p10)
}
  0x1a   :  { %s247_s8 = scalar_lea.vmem %s31_s27, 512  ;;  %p252_p12 = scmp.lt.s32.totalorder %s31_s27, %s31_s27 }
  0x1b   :  { %p248_p11 = scmp.ne.s32.totalorder %s31_s27, %s247_s8  ;;  %p253_p13 = scmp.lt.s32.totalorder %s247_s8, %s247_s8 }
  0x1d   :  { %p254_p0 = por %p253_p13, %p252_p12 }
  0x1f   :  { %p255_p1 = pnand %p254_p0, %p248_p11 }
  0x21   :  { %258 = shalt.err (!%p255_p1)
}
  0x22   :  { %36 = dma.hbm_to_vmem [thread:$0]  %s366_s2, 512, %s31_s27, [#allocation6], %s288_s22, %s288_s22, %s289_s23  }
  0x23   :  { %281 = dma.done.wait [#allocation3], 256  }
  0x24   :  { %282 = vsyncadd [#allocation3], 4294967040 }
  0x25   :  { %283 = dma.done.wait [#allocation6], 512  }
  0x26   :  { %284 = vsyncadd [#allocation6], 4294966784  ;;  %v43_v0 = vld [vmem:[#allocation2] sm:$0xff]  ;;  %vm47_vm0 = vcmask 261120   ;;  %v44_v1 = vld [vmem:[#allocation2 + $0x8] sm:$0xff]  ;;  %s291_s11 = smov [#allocation7]  }
  0x27   :  { %v45_v2 = vmul.f32 %v43_v0, %v43_v0  ;;  %v46_v3 = vmul.f32 %v44_v1, %v44_v1  ;;  %v72_v6 = vld [vmem:[#allocation5] sm:$0xff]  ;;  %v73_v7 = vld [vmem:[#allocation5 + $0x8] sm:$0xff]  ;;  %v74_v8 = vld [vmem:[#allocation5 + $0x10] sm:$0xff]  ;;  %s165_s12 = sshll.u32 %s291_s11, 4  ;;  %vm157_vm1 = vcmask 523264   ;;  %s166_s12 = int_to_ptr.vmem [resolvable:$true] %s165_s12 }
  0x28   :  { %v198_v9 = vpack.c.bf16 %v73_v7, %v72_v6  ;;  %v75_v10 = vld [vmem:[#allocation5 + $0x18] sm:$0xff]  ;;  %v178_v19 = vld [vmem:[%s365_s1] ss:$0 sm:$0xff]  ;;  %s259_s13 = scalar_lea.vmem %s166_s12, 256  ;;  %p264_p3 = scmp.lt.s32.totalorder %s166_s12, %s166_s12 }
  0x29   :  { %v48_v4 = vsel %vm47_vm0, %v45_v2, 0.0  ;;  %v51_v5 = vsel %vm47_vm0, %v46_v3, 0.0  ;;  %v202_v11 = vpack.c.bf16 %v75_v10, %v74_v8  ;;  %p260_p2 = scmp.ne.s32.totalorder %s166_s12, %s259_s13  ;;  %p265_p4 = scmp.lt.s32.totalorder %s259_s13, %s259_s13 }
  0x2a   :  { %49 = vadd.xlane.f32.xlu0 %v48_v4  ;;  %199 = vmatprep.subr.bf16.mxu0 %v198_v9 }
  0x2b   :  { %201 = vmatpush3.bf16.msra.mxu0 %v198_v9  ;;  %p266_p5 = por %p265_p4, %p264_p3 }
  0x2c   :  { %203 = vmatprep.subr.bf16.mxu0 %v202_v11 }
  0x2d   :  { %p267_p6 = pnand %p266_p5, %p260_p2 }
  0x2e   :  { %52 = vadd.xlane.f32.xlu0 %v51_v5 }
  0x2f   :  { %205 = vmatpush3.bf16.msra.mxu0 %v202_v11 }
  0xb7   :  { %v50_v12 = vpop.xlane.xlu0 %49 }
  0xb8   :  { %v55_v13 = vmul.f32 0.03125, %v50_v12 }
  0xba   :  { %v57_v14 = vadd.f32 1e-06, %v55_v13 }
  0xbb   :  { %v53_v15 = vpop.xlane.xlu0 %52 }
  0xbc   :  { %211 = vrsqrt.f32 %v57_v14  ;;  %v56_v16 = vmul.f32 0.03125, %v53_v15 }
  0xbe   :  { %v58_v17 = vadd.f32 1e-06, %v56_v16 }
  0xc0   :  { %213 = vrsqrt.f32 %v58_v17 }
  0xc6   :  { %v212_v18 = vpop.eup %211 }
  0xc7   :  { %v61_v20 = vmul.f32 %v212_v18, %v43_v0 }
  0xc9   :  { %v70_v21 = vmul.f32 %v178_v19, %v61_v20 }
  0xca   :  { %v214_v22 = vpop.eup %213 }
  0xcb   :  { %v62_v23 = vmul.f32 %v214_v22, %v44_v1  ;;  %195 = vmatprep.mubr.msk.f32.mxu0 %vm47_vm0, %v70_v21 }
  0xcd   :  { %v71_v24 = vmul.f32 %v178_v19, %v62_v23 }
  0xcf   :  { %196 = vmatmul.mubr.msk.f32.vlgmr.msra.gmra.mrb[0].mxu0 %vm47_vm0, %v71_v24 }
 0x1a2   :  { %v197_v25 = vpop.f32.mrb[0].mxu0 }
 0x1a3   :  { %159 = vst.msk [vmem:[#allocation7 + $0x8] sm:$0xff] %vm157_vm1, %v197_v25  ;;  %v148_v26 = vpop.f32.mrb[1].mxu0 }
 0x1a4   :  { %158 = vst.msk [vmem:[#allocation7] sm:$0xff] %vm157_vm1, %v148_v26 }
 0x1a5   :  { %270 = shalt.err (!%p267_p6)
}
 0x1a6   :  { %s271_s15 = scalar_lea.hbm %s367_s3, 256 }
 0x1a7   :  { %p272_p7 = scmp.ne.s32.totalorder %s367_s3, %s271_s15  ;;  %p275_p8 = scmp.lt.u32.totalorder %s271_s15, %s367_s3 }
 0x1a9   :  { %p277_p9 = pnand %p275_p8, %p272_p7 }
 0x1ab   :  { %280 = shalt.err (!%p277_p9)
}
 0x1ac   :  { %171 = dma.vmem_to_hbm [thread:$0]  %s166_s12, 256, %s367_s3, [#allocation4], %s288_s22, %s288_s22, %s289_s23  }
 0x1ad   :  { %285 = dma.done.wait [#allocation4], 256  }
 0x1ae   :  { %286 = vsyncadd [#allocation4], 4294967040 }
 0x1af   :  { %175 = vsyncpa [#allocation3], 1 }
 0x1b0   :  { %176 = vsyncpa [#allocation6], 1 }
 0x1b1   :  { %177 = vsyncpa [#allocation4], 1 }

</bundles_post_ra>
